<compile_context>
chip_gen: v7x
topology: tpu7x:2x2x1
jax: 0.10.0
libtpu: 0.0.40
codegen_flags: <defaults>
</compile_context>

<pallas_src>
import numpy as np

import jax
import jax.numpy as jnp
from jax.experimental import pallas as pl
from jax.experimental.pallas import tpu as pltpu


def attention_block_kernel(g_ref, x_ref, wg_ref, wx_ref, wp_ref,
                           bgx_ref, bp_ref, o_ref):
    # Channel-major blocks: activations (1, C, Ts), weights (C_out, C_in).
    g = g_ref[0]                    # (F_g, Ts)
    x = x_ref[0]                    # (F_l, Ts)

    # a = ReLU(BN(Conv_g(g)) + BN(Conv_x(x)))  -- BN folded, biases fused.
    # NOTE: for tiny channel counts the MXU is <1% utilized; the kernel is
    # HBM-bandwidth bound, so the matmul shape is not the bottleneck.
    a = (jnp.dot(wg_ref[...], g, preferred_element_type=jnp.float32)
         + jnp.dot(wx_ref[...], x, preferred_element_type=jnp.float32)
         + bgx_ref[...])            # (F_int, Ts) + (F_int, 1) lane-broadcast
    a = jnp.maximum(a, 0.0)

    # psi = sigmoid(BN(Conv_psi(a)))  -> (1, Ts); psi bias is an SMEM scalar.
    p = jnp.dot(wp_ref[...], a, preferred_element_type=jnp.float32) + bp_ref[0]
    psi = jax.nn.sigmoid(p)

    # out = x * psi + x  ==  x * (psi + 1)   (saves one full-width VPU add)
    o_ref[0] = (x * (psi + 1.0)).astype(o_ref.dtype)


def fold_bn(w, b, gamma, beta, mean, var, eps=1e-5):
    """Fold eval-mode BatchNorm into a 1x1-conv weight/bias.

    w: (C_in, C_out) matmul weight, b: (C_out,)  ->  effective (w, b)."""
    inv_std = gamma / jnp.sqrt(var + eps)
    w_eff = w * inv_std[None, :]
    b_eff = (b - mean) * inv_std + beta
    return w_eff, b_eff


def _choose_spatial_tile(S, n_batch, per_col_bytes, budget_bytes, max_tile=4096):
    """Largest multiple-of-128 divisor of S whose VMEM footprint fits budget."""
    if S % 128 != 0:
        # TODO(synk): pad ragged spatial extents instead of one full-extent block.
        return S
    best = 128
    t = 256
    cap = min(S, max_tile)
    while t <= cap:
        if S % t == 0 and t * per_col_bytes <= budget_bytes:
            best = t
        t += 128
    # Keep >= 2 total grid steps so v7x's second TensorCore is not idle.
    while n_batch * (S // best) < 2 and best % 256 == 0:
        best //= 2
    return best


def attention_block(g, x, params, *, compute_dtype=None, out_dtype=None,
                    vmem_budget_bytes=12 * 1024 * 1024):
    """g: (N, F_g, H, W), x: (N, F_l, H, W)  ->  (N, F_l, H, W)."""
    N, F_g, H, W = g.shape
    N2, F_l, H2, W2 = x.shape
    assert (N, H, W) == (N2, H2, W2)
    S = H * W

    act_dtype = np.dtype(compute_dtype) if compute_dtype is not None else np.dtype(g.dtype)
    out_dt = np.dtype(out_dtype) if out_dtype is not None else np.dtype(x.dtype)

    # Fold eval-mode BatchNorm into the 1x1-conv weights/biases; transpose the
    # weights to channel-major (C_out, C_in); fuse the two gating biases.
    wg, bg = fold_bn(params["wg"], params["bg"], *params["bn_g"])
    wx, bx = fold_bn(params["wx"], params["bx"], *params["bn_x"])
    wp, bp = fold_bn(params["wp"], params["bp"], *params["bn_p"])
    F_int = wg.shape[1]

    wgT = wg.T.astype(act_dtype)                     # (F_int, F_g)
    wxT = wx.T.astype(act_dtype)                     # (F_int, F_l)
    wpT = wp.T.astype(jnp.float32)                   # (1, F_int)
    bgx = (bg + bx).reshape(F_int, 1).astype(jnp.float32)
    bp1 = bp.reshape(1).astype(jnp.float32)          # scalar -> SMEM

    # NCHW -> (N, C, S): contiguous reshape, no transpose / extra HBM pass.
    g3 = g.reshape(N, F_g, S).astype(act_dtype)
    x3 = x.reshape(N, F_l, S).astype(act_dtype)

    # Per-spatial-column VMEM bytes: double-buffered g/x/out blocks plus
    # rough f32 intermediates (a, psi).
    per_col = (2 * (F_g + F_l) * act_dtype.itemsize
               + 2 * F_l * out_dt.itemsize
               + (F_int + 4) * 4)
    tile = _choose_spatial_tile(S, N, per_col, vmem_budget_bytes)

    weight_bytes = 2 * 4 * (F_int * (F_g + F_l) + 2 * F_int + 1)
    vmem_need = per_col * tile + weight_bytes
    vmem_limit = min(32 * 1024 * 1024,
                     max(16 * 1024 * 1024, int(1.5 * vmem_need)))

    blk = lambda n, s: (n, 0, s)      # batch- and spatial-tiled activations
    rep = lambda n, s: (0, 0)         # weights/biases resident every step

    out3 = pl.pallas_call(
        attention_block_kernel,
        out_shape=jax.ShapeDtypeStruct((N, F_l, S), out_dt),
        grid_spec=pltpu.PrefetchScalarGridSpec(
            num_scalar_prefetch=0,
            grid=(N, S // tile),
            in_specs=[
                pl.BlockSpec((1, F_g, tile), blk),                  # g
                pl.BlockSpec((1, F_l, tile), blk),                  # x
                pl.BlockSpec((F_int, F_g), rep),                    # Wg^T
                pl.BlockSpec((F_int, F_l), rep),                    # Wx^T
                pl.BlockSpec((1, F_int), rep),                      # Wpsi^T
                pl.BlockSpec((F_int, 1), rep),                      # bg + bx
                pl.BlockSpec(memory_space=pltpu.MemorySpace.SMEM),  # b_psi scalar
            ],
            out_specs=pl.BlockSpec((1, F_l, tile), blk),
        ),
        compiler_params=pltpu.CompilerParams(
            dimension_semantics=("parallel", "parallel"),
            vmem_limit_bytes=vmem_limit),
    )(g3, x3, wgT, wxT, wpT, bgx, bp1)

    # (N, F_l, S) -> NCHW: contiguous reshape, free.
    return out3.reshape(N, F_l, H, W)


def reference(g, x, params):
    """Pure-JAX reference (same eval-mode BN semantics)."""
    wg, bg = fold_bn(params["wg"], params["bg"], *params["bn_g"])
    wx, bx = fold_bn(params["wx"], params["bx"], *params["bn_x"])
    wp, bp = fold_bn(params["wp"], params["bp"], *params["bn_p"])
    g2 = jnp.transpose(g, (0, 2, 3, 1))
    x2 = jnp.transpose(x, (0, 2, 3, 1))
    a = jnp.maximum(g2 @ wg + bg + x2 @ wx + bx, 0.0)
    psi = jax.nn.sigmoid(a @ wp + bp)
    out = x2 * psi + x2
    return jnp.transpose(out, (0, 3, 1, 2))


def make_params(key, F_g, F_l, F_int):
    ks = jax.random.split(key, 12)
    def bn(k, c):
        k1, k2, k3, k4 = jax.random.split(k, 4)
        gamma = 1.0 + 0.1 * jax.random.normal(k1, (c,), jnp.float32)
        beta = 0.1 * jax.random.normal(k2, (c,), jnp.float32)
        mean = 0.1 * jax.random.normal(k3, (c,), jnp.float32)
        var = jnp.abs(1.0 + 0.1 * jax.random.normal(k4, (c,), jnp.float32))
        return (gamma, beta, mean, var)
    return {
        # 1x1 conv weights stored as (C_in, C_out) matmul weights
        "wg": 0.3 * jax.random.normal(ks[0], (F_g, F_int), jnp.float32),
        "bg": 0.1 * jax.random.normal(ks[1], (F_int,), jnp.float32),
        "wx": 0.3 * jax.random.normal(ks[2], (F_l, F_int), jnp.float32),
        "bx": 0.1 * jax.random.normal(ks[3], (F_int,), jnp.float32),
        "wp": 0.3 * jax.random.normal(ks[4], (F_int, 1), jnp.float32),
        "bp": 0.1 * jax.random.normal(ks[5], (1,), jnp.float32),
        "bn_g": bn(ks[6], F_int),
        "bn_x": bn(ks[7], F_int),
        "bn_p": bn(ks[8], 1),
    }


if __name__ == "__main__":
    key = jax.random.PRNGKey(0)
    kg, kx, kp = jax.random.split(key, 3)

    N, F_g, F_l, F_int, H, W = 2, 4, 4, 8, 16, 16
    g = jax.random.normal(kg, (N, F_g, H, W), jnp.float32)
    x = jax.random.normal(kx, (N, F_l, H, W), jnp.float32)
    params = make_params(kp, F_g, F_l, F_int)

    ref = reference(g, x, params)

    # f32 path (tight tolerance).
    out = jax.block_until_ready(attention_block(g, x, params))
    assert out.shape == (N, F_l, H, W)
    assert jnp.allclose(out, ref, atol=1e-4, rtol=1e-4), "f32 mismatch vs reference"

    # bf16 activation path (halves HBM traffic); loose tolerance vs f32 ref.
    out_bf16 = jax.block_until_ready(
        attention_block(g, x, params, compute_dtype=jnp.bfloat16))
    assert out_bf16.shape == (N, F_l, H, W)
    assert jnp.allclose(out_bf16, ref, atol=5e-2, rtol=5e-2), \
        "bf16 mismatch vs reference"

    print("KERNEL_OK")
</pallas_src>

<mosaic_0001>
module attributes {stable_mosaic.version = 11 : i64} {
  func.func @attention_block_kernel(%arg0: i32, %arg1: i32, %arg2: memref<1x4x256xf32, #tpu.memory_space<vmem>>, %arg3: memref<1x4x256xf32, #tpu.memory_space<vmem>>, %arg4: memref<8x4xf32, #tpu.memory_space<vmem>>, %arg5: memref<8x4xf32, #tpu.memory_space<vmem>>, %arg6: memref<1x8xf32, #tpu.memory_space<vmem>>, %arg7: memref<8x1xf32, #tpu.memory_space<vmem>>, %arg8: memref<1xf32, #tpu.memory_space<smem>>, %arg9: memref<1x4x256xf32, #tpu.memory_space<vmem>>) attributes {dimension_semantics = [#tpu.dimension_semantics<parallel>, #tpu.dimension_semantics<parallel>], iteration_bounds = array<i64: 2, 1>, scalar_prefetch = 0 : i64, scratch_operands = 0 : i64, tpu.core_type = #tpu.core_type<tc>, window_params = [{transform_indices = @transform_0, window_bounds = array<i64: 1, 4, 256>}, {transform_indices = @transform_1, window_bounds = array<i64: 1, 4, 256>}, {pipeline_mode = #tpu.pipeline_mode<synchronous>, transform_indices = @transform_2, window_bounds = array<i64: 8, 4>}, {pipeline_mode = #tpu.pipeline_mode<synchronous>, transform_indices = @transform_3, window_bounds = array<i64: 8, 4>}, {pipeline_mode = #tpu.pipeline_mode<synchronous>, transform_indices = @transform_4, window_bounds = array<i64: 1, 8>}, {pipeline_mode = #tpu.pipeline_mode<synchronous>, transform_indices = @transform_5, window_bounds = array<i64: 8, 1>}, {transform_indices = @transform_6, window_bounds = array<i64: 1>}, {transform_indices = @transform_7, window_bounds = array<i64: 1, 4, 256>}]} {
    %c0 = arith.constant 0 : index
    %c0_0 = arith.constant 0 : index
    %c0_1 = arith.constant 0 : index
    %0 = vector.load %arg2[%c0, %c0_0, %c0_1] : memref<1x4x256xf32, #tpu.memory_space<vmem>>, vector<1x4x256xf32>
    %1 = vector.shape_cast %0 : vector<1x4x256xf32> to vector<4x256xf32>
    %c0_2 = arith.constant 0 : index
    %c0_3 = arith.constant 0 : index
    %c0_4 = arith.constant 0 : index
    %2 = vector.load %arg3[%c0_2, %c0_3, %c0_4] : memref<1x4x256xf32, #tpu.memory_space<vmem>>, vector<1x4x256xf32>
    %3 = vector.shape_cast %2 : vector<1x4x256xf32> to vector<4x256xf32>
    %c0_5 = arith.constant 0 : index
    %c0_6 = arith.constant 0 : index
    %4 = vector.load %arg4[%c0_5, %c0_6] : memref<8x4xf32, #tpu.memory_space<vmem>>, vector<8x4xf32>
    %cst = arith.constant dense<0.000000e+00> : vector<8x256xf32>
    %5 = tpu.matmul %4, %1, %cst {dimension_numbers = #tpu.dot_dimension_numbers<[1], [0], [0], [1], [0, 0, 1, 1], [], []>} : vector<8x4xf32>, vector<4x256xf32>, vector<8x256xf32> -> vector<8x256xf32>
    %c0_7 = arith.constant 0 : index
    %c0_8 = arith.constant 0 : index
    %6 = vector.load %arg5[%c0_7, %c0_8] : memref<8x4xf32, #tpu.memory_space<vmem>>, vector<8x4xf32>
    %cst_9 = arith.constant dense<0.000000e+00> : vector<8x256xf32>
    %7 = tpu.matmul %6, %3, %cst_9 {dimension_numbers = #tpu.dot_dimension_numbers<[1], [0], [0], [1], [0, 0, 1, 1], [], []>} : vector<8x4xf32>, vector<4x256xf32>, vector<8x256xf32> -> vector<8x256xf32>
    %8 = arith.addf %5, %7 : vector<8x256xf32>
    %c0_10 = arith.constant 0 : index
    %c0_11 = arith.constant 0 : index
    %9 = vector.load %arg7[%c0_10, %c0_11] : memref<8x1xf32, #tpu.memory_space<vmem>>, vector<8x1xf32>
    %10 = vector.broadcast %9 : vector<8x1xf32> to vector<8x256xf32>
    %11 = arith.addf %8, %10 : vector<8x256xf32>
    %cst_12 = arith.constant 0.000000e+00 : f32
    %12 = vector.broadcast %cst_12 : f32 to vector<8x256xf32>
    %13 = arith.maximumf %11, %12 : vector<8x256xf32>
    %c0_13 = arith.constant 0 : index
    %c0_14 = arith.constant 0 : index
    %14 = vector.load %arg6[%c0_13, %c0_14] : memref<1x8xf32, #tpu.memory_space<vmem>>, vector<1x8xf32>
    %cst_15 = arith.constant dense<0.000000e+00> : vector<1x256xf32>
    %15 = tpu.matmul %14, %13, %cst_15 {dimension_numbers = #tpu.dot_dimension_numbers<[1], [0], [0], [1], [0, 0, 1, 1], [], []>} : vector<1x8xf32>, vector<8x256xf32>, vector<1x256xf32> -> vector<1x256xf32>
    %c0_16 = arith.constant 0 : index
    %16 = memref.load %arg8[%c0_16] : memref<1xf32, #tpu.memory_space<smem>>
    %17 = vector.broadcast %16 : f32 to vector<1x256xf32>
    %18 = arith.addf %15, %17 : vector<1x256xf32>
    %19 = arith.negf %18 : vector<1x256xf32>
    %20 = math.exp %19 : vector<1x256xf32>
    %cst_17 = arith.constant 1.000000e+00 : f32
    %21 = vector.broadcast %cst_17 : f32 to vector<1x256xf32>
    %22 = arith.addf %21, %20 : vector<1x256xf32>
    %23 = arith.divf %21, %22 : vector<1x256xf32>
    %cst_18 = arith.constant 1.000000e+00 : f32
    %24 = vector.broadcast %cst_18 : f32 to vector<1x256xf32>
    %25 = arith.addf %23, %24 : vector<1x256xf32>
    %26 = vector.broadcast %25 : vector<1x256xf32> to vector<4x256xf32>
    %27 = arith.mulf %3, %26 : vector<4x256xf32>
    %c0_19 = arith.constant 0 : index
    %c0_20 = arith.constant 0 : index
    %c0_21 = arith.constant 0 : index
    %28 = vector.load %arg9[%c0_19, %c0_20, %c0_21] : memref<1x4x256xf32, #tpu.memory_space<vmem>>, vector<1x4x256xf32>
    %29 = vector.shape_cast %28 : vector<1x4x256xf32> to vector<4x256xf32>
    %30 = vector.shape_cast %27 : vector<4x256xf32> to vector<1x4x256xf32>
    tpu.vector_store %arg9[%c0_19, %c0_20, %c0_21], %30 {strides = array<i32>} : memref<1x4x256xf32, #tpu.memory_space<vmem>>, vector<1x4x256xf32>,
    return
  }
  func.func @transform_0(%arg0: i32, %arg1: i32) -> (i32, i32, i32) {
    %c0_i32 = arith.constant 0 : i32
    %c0_i32_0 = arith.constant 0 : i32
    return %arg0, %c0_i32, %arg1 : i32, i32, i32
  }
  func.func @transform_1(%arg0: i32, %arg1: i32) -> (i32, i32, i32) {
    %c0_i32 = arith.constant 0 : i32
    %c0_i32_0 = arith.constant 0 : i32
    return %arg0, %c0_i32, %arg1 : i32, i32, i32
  }
  func.func @transform_2(%arg0: i32, %arg1: i32) -> (i32, i32) {
    %c0_i32 = arith.constant 0 : i32
    %c0_i32_0 = arith.constant 0 : i32
    %c0_i32_1 = arith.constant 0 : i32
    return %c0_i32, %c0_i32_0 : i32, i32
  }
  func.func @transform_3(%arg0: i32, %arg1: i32) -> (i32, i32) {
    %c0_i32 = arith.constant 0 : i32
    %c0_i32_0 = arith.constant 0 : i32
    %c0_i32_1 = arith.constant 0 : i32
    return %c0_i32, %c0_i32_0 : i32, i32
  }
  func.func @transform_4(%arg0: i32, %arg1: i32) -> (i32, i32) {
    %c0_i32 = arith.constant 0 : i32
    %c0_i32_0 = arith.constant 0 : i32
    %c0_i32_1 = arith.constant 0 : i32
    return %c0_i32, %c0_i32_0 : i32, i32
  }
  func.func @transform_5(%arg0: i32, %arg1: i32) -> (i32, i32) {
    %c0_i32 = arith.constant 0 : i32
    %c0_i32_0 = arith.constant 0 : i32
    %c0_i32_1 = arith.constant 0 : i32
    return %c0_i32, %c0_i32_0 : i32, i32
  }
  func.func @transform_6(%arg0: i32, %arg1: i32) -> i32 {
    %c0_i32 = arith.constant 0 : i32
    %c0_i32_0 = arith.constant 0 : i32
    return %c0_i32 : i32
  }
  func.func @transform_7(%arg0: i32, %arg1: i32) -> (i32, i32, i32) {
    %c0_i32 = arith.constant 0 : i32
    %c0_i32_0 = arith.constant 0 : i32
    return %arg0, %c0_i32, %arg1 : i32, i32, i32
  }
}

</mosaic_0001>

<bundles_post_ra>
// kernel: tpu_custom_call.1
= control target key start
LH: loop header
LB: loop body
LE: loop exit
PB: predicated region body
PF: predicated region fallthrough
CT: control target
= control target key end

     0   :  { %s1088_s0 = inlined_call_operand.vmem [shape: f32[2,4,256], index: 0, kind: input, shape index: {}]   ;;  %s1089_s1 = inlined_call_operand.vmem [shape: f32[2,4,256], index: 1, kind: input, shape index: {}]   ;;  %s1090_s2 = inlined_call_operand.vmem [shape: f32[8,4], index: 2, kind: input, shape index: {}]   ;;  %s1091_s3 = inlined_call_operand.vmem [shape: f32[8,4], index: 3, kind: input, shape index: {}]   ;;  %s1092_s4 = inlined_call_operand.vmem [shape: f32[1,8], index: 4, kind: input, shape index: {}]   ;;  %s1093_s5 = inlined_call_operand.vmem [shape: f32[8,1], index: 5, kind: input, shape index: {}]   ;;  %s1094_s6 = inlined_call_operand.<no memory space> [shape: f32[1], index: 6, kind: input, shape index: {}]   ;;  %s1095_s7 = inlined_call_operand.hbm [shape: f32[2,4,256], index: 7, kind: output, shape index: {}]  }
   0x1   :  { %12 = sst [smem:[#allocation2]] %s1094_s6 }
   0x2   :  { %13 = vsyncpa [#allocation4], 0 }
   0x3   :  { %15 = vsyncpa [#allocation4 + $0x1], 0  ;;  %s961_s26 = smov 0   ;;  %s963_s27 = smov 0  }
   0x4   :  { %s965_s28 = smov 0   ;;  %s967_s29 = smov 0  }
   0x5   :  { %s969_s30 = smov 0   ;;  %s971_s8 = smov 0  }
   0x6 LB: > { %s738_s6 = sadd.s32 4294967295, %s913_s8   ;;  %s739_s9 = sadd.s32 4294967294, %s913_s8   ;;  %s913_s8 = sphi %s971_s8, %s21_s8   ;;  %s909_s30 = sphi %s969_s30, %s1102_s30   ;;  %s905_s29 = sphi %s967_s29, %s1101_s29   ;;  %s901_s28 = sphi %s965_s28, %s1100_s28   ;;  %s897_s27 = sphi %s963_s27, %s1099_s27   ;;  %s893_s26 = sphi %s961_s26, %s1098_s26  }
   0x7   : > { %s33_s10 = sadd.s32 1, %s909_s30  ;;  %s203_s11 = sadd.s32 1, %s901_s28 }
   0x8   : > { %p35_p0 = scmp.ge.s32.totalorder %s33_s10, 2  ;;  %p213_p1 = scmp.ne.s32.totalorder %s901_s28, %s897_s27 }
   0x9   : > { %p214_p2 = scmp.eq.s32.totalorder %s738_s6, 1  ;;  %p219_p3 = scmp.ne.s32.totalorder %s897_s27, %s893_s26 }
   0xa   : > { %s1104_s10 = smov (%p35_p0, %s33_s10), 0  ;;  %p220_p5 = scmp.eq.s32.totalorder %s739_s9, 1 }
   0xb   : > { %p1001_p4 = por %p214_p2, %p213_p1  ;;  %s198_s13 = ssub.s32 %s909_s30, %s1104_s10 }
   0xc   : > { %p742_p6 = scmp.ge.s32.totalorder %s913_s8, 1  ;;  %p201_p7 = scmp.eq.s32.totalorder %s198_s13, 0 }
   0xd   : > { %p1008_p8 = por %p220_p5, %p219_p3  ;;  %p279_p9 = scmp.lt.s32.totalorder %s913_s8, 3 }
   0xe   : > { %s1014_s15 = scalar_select %p201_p7, %s901_s28, %s203_s11  }
   0xf   : > { %p280_p10 = pnand %p742_p6, %p279_p9 }
  0x10   : > { %p325_p11 = scmp.lt.s32.totalorder (!%p280_p10), %s905_s29, 1  ;;  %v915_v0 = vmov (!%p280_p10), 0.0   ;;  %v511_v1 = vld [vmem:[%s1093_s5] sm:$0xff] (!%p280_p10)  ;;  %v916_v2 = vmov (!%p280_p10), 0   ;;  %vm355_vm0 = vcmask (!%p280_p10), 1043456   ;;  %vm351_vm1 = vcmask (!%p280_p10), 31744  }
  0x11   : > { %283 = sbr.rel (%p280_p10) target bundleno = 524 (0x20c), region = 48  ;;  %424 = vmatprep.mubr.f32.mxu0 (!%p280_p10), %v915_v0  ;;  %592 = vmatprep.mubr.f32.mxu1 (!%p280_p10), %v915_v0  ;;  %v348_v7 = vld [vmem:[%s1091_s3] sm:$0xff] (!%p280_p10)  ;;  %vm524_vm2 = vcmask (!%p280_p10), 64512   ;;  %v613_v28 = vlaneseq (!%p280_p10)  ;;  %s764_s21 = sshll.u32 (!%p280_p10), %s905_s29, 7 }
  0x12   : > { %824 = vset.pattern.permute.xlu0 (!%p280_p10), %v916_v2  ;;  %v347_v8 = vld [vmem:[%s1090_s2] sm:$0xff] (!%p280_p10)  ;;  %s1041_s6 = scalar_lea.hbm (!%p280_p10), %s1095_s7, %s764_s21 }
  0x13   : > { %514 = vperm.xlu0 (!%p280_p10), %824, %v511_v1   ;;  %v521_v16 = vld [vmem:[%s1092_s4] sm:$0x1] (!%p280_p10)  ;;  %v614_v29 = vshrl.u32 (!%p280_p10), %v613_v28, 7 }
  0x15   : > { %v615_v30 = vsub.s32 (!%p280_p10), 0, %v614_v29 }
  0x18   : > { %s326_s18 = scalar_select %p325_p11, %s905_s29, 1 }
  0x19   : > { %s917_s29 = smov [#allocation3]  }
  0x1a   : > { %s762_s19 = sshll.u32 %s326_s18, 3  ;;  %s522_s18 = sld [smem:[#allocation2]] }
  0x1b   : > { %s332_s22 = scalar_lea.vmem %s1088_s0, %s762_s19  ;;  %s342_s25 = scalar_lea.vmem %s1089_s1, %s762_s19 }
  0x1c   : > { %v345_v3 = vld [vmem:[%s332_s22] sm:$0xff]  ;;  %s321_s19 = sand.u32 1, %s897_s27   ;;  %s839_s13 = sshll.u32 %s917_s29, 4  ;;  %s840_s13 = int_to_ptr.vmem [resolvable:$false] %s839_s13 }
  0x1d   : > { %v346_v4 = vld [vmem:[%s342_s25] sm:$0xff]  ;;  %v432_v6 = vcombine.high %v345_v3, %v345_v3  ;;  %s743_s20 = sshll.u32 %s321_s19, 3  ;;  %s628_s9 = scalar_lea.sflag [#allocation4], %s321_s19 }
  0x1e   : > { %v350_v5 = vcombine.high %v346_v4, %v346_v4  ;;  %s323_s22 = scalar_lea.vmem [#allocation3], %s743_s20  ;;  %s841_s16 = scalar_lea.vmem %s840_s13, 256 }
  0x1f   : > { %s644_s23 = sshll.u32 %s323_s22, 4  ;;  %s1043_s23 = int_to_ptr.vmem [resolvable:$true] %s644_s23 }
  0x20   : > { %748 = vmatprep.subr.msk.mxu0 %vm355_vm0, %v350_v5  ;;  %v523_v17 = vstv %s522_s18  ;;  %s835_s11 = scalar_lea.vmem %s1043_s23, 128  ;;  %p842_p1 = scmp.lt.s32.totalorder %s1043_s23, %s840_s13 }
  0x21   : > { %749 = vmatpush1.msk.msra.mxu0 %vm355_vm0, %v346_v4  ;;  %p836_p12 = scmp.ne.s32.totalorder %s1043_s23, %s835_s11  ;;  %p843_p2 = scmp.lt.s32.totalorder %s841_s16, %s835_s11 }
  0x22   : > { %750 = vmatmul.mubr.msk.f32.vlgmr.msra.gmra.mrb[0].mxu0 %vm351_vm1, %v348_v7  ;;  %751 = vmatprep.subr.msk.mxu0 %vm355_vm0, %v432_v6 }
  0x23   : > { %752 = vmatpush1.msk.msra.mxu0 %vm355_vm0, %v345_v3  ;;  %504 = vmatprep.mubr.f32.mxu0 %v915_v0  ;;  %p837_p13 = pnand %p836_p12, %p1001_p4  ;;  %p844_p3 = por %p843_p2, %p842_p1 }
  0x25   : > { %p838_p0 = pneg %p837_p13 }
  0x27   : > { %p845_p5 = pnand %p844_p3, %p838_p0 }
  0x2a   : > { %753 = vmatmul.mubr.msk.f32.vlgmr.msra.gmra.mrb[0].mxu0 %vm351_vm1, %v347_v8 }
  0x92   : > { %v515_v9 = vpop.permute.xlu0 %514 }
  0xfd   : > { %v506_v10 = vpop.f32.mrb[0].mxu0 }
  0xfe   : > { %v517_v11 = vadd.f32 %v515_v9, %v506_v10  ;;  %v508_v12 = vpop.f32.mrb[1].mxu0 }
  0xff   : > { %v518_v13 = vadd.f32 %v515_v9, %v508_v12 }
 0x100   : > { %v519_v15 = vmax.f32 %v517_v11, 0.0 }
 0x101   : > { %v520_v14 = vmax.f32 %v518_v13, 0.0 }
 0x103   : > { %528 = vmatprep.subr.mxu1 %v520_v14 }
 0x104   : > { %529 = vmatpush1.msra.mxu1 %v519_v15 }
 0x105   : > { %754 = vmatmul.mubr.msk.f32.vlgmr.msra.gmra.mrb[0].mxu1 %vm524_vm2, %v521_v16 }
 0x1d8   : > { %v594_v18 = vpop.f32.mrb[0].mxu1 }
 0x1d9   : > { %v595_v19 = vadd.f32 %v594_v18, %v523_v17  ;;  %v596_v20 = vpop.f32.mrb[1].mxu1 }
 0x1da   : > { %v597_v21 = vadd.f32 %v596_v20, %v523_v17 }
 0x1db   : > { %v755_v22 = vmul.f32 -1.442695, %v595_v19 }
 0x1dc   : > { %v756_v23 = vmul.f32 -1.442695, %v597_v21 }
 0x1dd   : > { %827 = vpow2.f32 %v755_v22 }
 0x1de   : > { %829 = vpow2.f32 %v756_v23 }
 0x1e7   : > { %v828_v24 = vpop.eup %827 }
 0x1e8   : > { %v830_v25 = vpop.eup %829  ;;  %v605_v26 = vadd.f32 1.0, %v828_v24 }
 0x1e9   : > { %v606_v27 = vadd.f32 1.0, %v830_v25 }
 0x1ea   : > { %831 = vrcp.f32 %v605_v26 }
 0x1eb   : > { %833 = vrcp.f32 %v606_v27 }
 0x1f4   : > { %v832_v31 = vpop.eup %831 }
 0x1f5   : > { %v834_v32 = vpop.eup %833  ;;  %v611_v33 = vadd.f32 1.0, %v832_v31 }
 0x1f6   : > { %v612_v34 = vadd.f32 1.0, %v834_v32 }
 0x1f7   : > { %v616_v35 = vrot.slane %v611_v33, %v615_v30 }
 0x1f8   : > { %v620_v36 = vrot.slane %v612_v34, %v615_v30 }
 0x1fa   : > { %v623_v37 = vcombine.low %v616_v35, %v620_v36 }
 0x1fc   : > { %v625_v38 = vmul.f32 %v623_v37, %v346_v4 }
 0x1fe   : > { %626 = vst [vmem:[%s323_s22] sm:$0xff] %v625_v38 }
 0x1ff   : > { %848 = shalt.err (!%p845_p5)
}
 0x200   : > { %s849_s17 = scalar_lea.hbm %s1041_s6, 128  ;;  %s853_s20 = scalar_lea.hbm %s1095_s7, 256 }
 0x201   : > { %p850_p6 = scmp.ne.s32.totalorder %s1041_s6, %s849_s17  ;;  %p854_p10 = scmp.lt.u32.totalorder %s1041_s6, %s1095_s7 }
 0x202   : > { %p855_p11 = scmp.lt.u32.totalorder %s853_s20, %s849_s17  ;;  %p857_p13 = scmp.lt.u32.totalorder %s849_s17, %s1041_s6 }
 0x203   : > { %p851_p7 = pnand %p850_p6, %p1001_p4 }
 0x204   : > { %p856_p12 = por %p855_p11, %p854_p10 }
 0x205   : > { %p852_p9 = pneg %p851_p7 }
 0x206   : > { %p858_p0 = por %p857_p13, %p856_p12 }
 0x208   : > { %p859_p1 = pnand %p858_p0, %p852_p9 }
 0x20a   : > { %862 = shalt.err (!%p859_p1)
}
 0x20b   : > { %767 = dma.vmem_to_hbm [thread:$0]  (%p1001_p4), %s1043_s23, 128, %s1041_s6, %s628_s9  }
 0x20c PF: > { %p773_p2 = scmp.ge.s32.totalorder %s913_s8, 2  ;;  %s656_s24 = sand.u32 1, %s893_s26  }
 0x20d   : > { %s657_s25 = scalar_lea.sflag [#allocation4], %s656_s24 }
 0x20e   : > { %p770_p3 = pnand %p773_p2, %p1008_p8 }
 0x210   : > { %888 = dma.done.wait (!%p770_p3), %s657_s25, 128  }
 0x211   : > { %890 = vsyncadd (!%p770_p3), %s657_s25, 4294967168  ;;  %s21_s8 = sadd.s32 1, %s913_s8   ;;  %s1098_s26 = smov %s897_s27 }
 0x212   : > { %p18_p5 = scmp.ge.s32.totalorder %s21_s8, 4   ;;  %s1099_s27 = smov %s901_s28 }
 0x213   : > { %s1100_s28 = smov %s1014_s15  ;;  %s1101_s29 = smov %s909_s30 }
 0x214   : > { %s1102_s30 = smov %s1104_s10  ;;  %20 = sbr.rel (!%p18_p5) target bundleno = 6 (0x6), region = 86 }
 0x21b   :  { %662 = vsyncpa [#allocation4], 1 }
 0x21c   :  { %664 = vsyncpa [#allocation4 + $0x1], 1 }

</bundles_post_ra>
